<compile_context>
chip_gen: v6e
topology: v6e:2x2x1
jax: 0.10.0
libtpu: 0.0.40
codegen_flags: <defaults>
</compile_context>

<pallas_src>
import functools
import math

import jax
import jax.numpy as jnp
from jax.experimental import pallas as pl
from jax.experimental.pallas import tpu as pltpu


def _conv_same_kernel(x_ref, w_ref, b_ref, o_ref, *, kh_size, kw_size, th, w_out):
    """One (batch, H-tile) grid step.

    x_ref : (1, Cin, BH, Wp)        haloed input block, BH >= th + kh_size - 1
    w_ref : (Cout, KH*KW*Cin)       filter matrix, rows ordered (kh, kw, ci)
    b_ref : (Cout, 1)               bias (f32)
    o_ref : (1, Cout, th * w_out)   lane-dense output tile
    """
    x = x_ref[0]                      # single aligned block load: (Cin, BH, Wp)
    cin = x.shape[0]

    # In-register im2col gather (no per-tap VMEM ref slicing; shifts are vreg ops).
    taps = []
    for kh in range(kh_size):
        for kw in range(kw_size):
            taps.append(x[:, kh:kh + th, kw:kw + w_out])          # (Cin, th, w_out)
    p = jnp.concatenate(taps, axis=0)                              # (K*K*Cin, th, w_out)
    p = p.reshape(kh_size * kw_size * cin, th * w_out)             # lane-dense RHS

    # One fused MXU matmul, f32 accumulation (contraction depth K*K*Cin).
    acc = jax.lax.dot_general(
        w_ref[...], p,
        dimension_numbers=(((1,), (0,)), ((), ())),
        preferred_element_type=jnp.float32,
    )                                                              # (Cout, th*w_out)
    acc = acc + b_ref[...].astype(jnp.float32)
    o_ref[0] = acc.astype(o_ref.dtype)


def _round_up(x, m):
    return ((x + m - 1) // m) * m


def conv2d_same(x_nchw, weight, bias, kernel_size, *, tile_h=None, mxu_dtype=None):
    """ReflectionPad2d((ka, kb, ka, kb)) + Conv2d(K, stride=1), PyTorch Conv2dSame.

    x_nchw : (N, Cin, H, W); weight : (Cout, Cin, K, K); bias : (Cout,).
    tile_h : output rows per grid step (None = auto).
    mxu_dtype : e.g. jnp.bfloat16 to run the matmul in bf16 with f32 accumulation.
    """
    k = int(kernel_size)
    ka = k // 2
    kb = ka - 1 if k % 2 == 0 else ka

    n, cin, h, w = x_nchw.shape
    cout = weight.shape[0]
    out_dtype = x_nchw.dtype
    r = k * k * cin

    # Reflection pad (left, right, top, bottom) = (ka, kb, ka, kb).
    x_pad = jnp.pad(x_nchw, ((0, 0), (0, 0), (ka, kb), (ka, kb)), mode="reflect")
    hp, wp = h + k - 1, w + k - 1

    # Filter as (Cout, K*K*Cin) matching the kernel's im2col row order (kh, kw, ci).
    w_mat = jnp.transpose(weight, (0, 2, 3, 1)).reshape(cout, r)
    b_col = bias.reshape(cout, 1).astype(jnp.float32)

    if mxu_dtype is not None:
        x_pad = x_pad.astype(mxu_dtype)
        w_mat = w_mat.astype(mxu_dtype)
    itemsize = jnp.dtype(x_pad.dtype).itemsize

    # ---- H-tile selection ---------------------------------------------------
    # TH*W must be a multiple of 128 (lane-dense output) unless a single tile
    # covers the whole height; keep TH a multiple of 8 so halo offsets/blocks
    # stay sublane-aligned.
    step = max(8, 128 // math.gcd(w, 128))
    if tile_h is None:
        budget = 512 * 1024                 # ~0.5 MiB input block (im2col temp ~K*K x that)
        th_guess = budget // max(1, cin * wp * itemsize) - (k - 1)
    else:
        th_guess = int(tile_h)
    th = max(step, (th_guess // step) * step)

    if th >= h:                             # single spatial tile
        th, n_t, bh = h, 1, hp
        rows_needed = hp
    else:
        n_t = -(-h // th)                   # ceil(h / th)
        bh = _round_up(th + k - 1, 8)       # haloed block height, 8-aligned
        rows_needed = (n_t - 1) * th + bh
    h_out_pad = n_t * th

    if rows_needed > hp:                    # bottom zero rows only feed discarded tail rows
        x_pad = jnp.pad(x_pad, ((0, 0), (0, 0), (0, rows_needed - hp), (0, 0)))

    # ---- block specs ----------------------------------------------------------
    if n_t == 1:
        x_spec = pl.BlockSpec((1, cin, bh, wp), lambda ni, ti: (ni, 0, 0, 0))
    else:
        # Overlapping halo windows: element row offset ti*th along the H axis.
        x_spec = pl.BlockSpec((1, cin, pl.Element(bh), wp),
                              lambda ni, ti: (ni, 0, ti * th, 0))

    in_block = cin * bh * wp * itemsize
    out_block = cout * th * w * jnp.dtype(out_dtype).itemsize
    p_block = r * th * w * itemsize
    need = (2 * (in_block + out_block) + 2 * (w_mat.size * itemsize + cout * 4)
            + in_block + p_block + cout * th * w * 4)
    vmem_limit = int(min(max(2 * need, 16 * 1024 * 1024), 64 * 1024 * 1024))

    kernel = functools.partial(
        _conv_same_kernel, kh_size=k, kw_size=k, th=th, w_out=w)

    out_flat = pl.pallas_call(
        kernel,
        out_shape=jax.ShapeDtypeStruct((n, cout, h_out_pad * w), out_dtype),
        grid_spec=pltpu.PrefetchScalarGridSpec(
            num_scalar_prefetch=0,
            grid=(n, n_t),
            in_specs=[
                x_spec,
                pl.BlockSpec((cout, r), lambda ni, ti: (0, 0)),
                pl.BlockSpec((cout, 1), lambda ni, ti: (0, 0)),
            ],
            out_specs=pl.BlockSpec((1, cout, th * w), lambda ni, ti: (ni, 0, ti)),
        ),
        compiler_params=pltpu.CompilerParams(
            dimension_semantics=("parallel", "parallel"),
            vmem_limit_bytes=vmem_limit,
        ),
        cost_estimate=pl.CostEstimate(
            flops=int(2 * n * h_out_pad * w * cout * r),
            transcendentals=0,
            bytes_accessed=int(n * n_t * in_block + w_mat.size * itemsize + cout * 4
                               + n * cout * h_out_pad * w
                               * jnp.dtype(out_dtype).itemsize),
        ),
    )(x_pad, w_mat, b_col)

    # Free trailing-dims reshape; slice only if H was padded up to a tile multiple.
    out = out_flat.reshape(n, cout, h_out_pad, w)
    if h_out_pad != h:
        out = out[:, :, :h, :]
    return out


def _torch_reference(x, weight, bias, kernel_size):
    """Pure-JAX reference for Conv2dSame: reflection pad + VALID conv."""
    k = kernel_size
    ka = k // 2
    kb = ka - 1 if k % 2 == 0 else ka
    xp = jnp.pad(x, ((0, 0), (0, 0), (ka, kb), (ka, kb)), mode="reflect")
    out = jax.lax.conv_general_dilated(
        xp, weight, window_strides=(1, 1), padding="VALID",
        dimension_numbers=("NCHW", "OIHW", "NCHW"))
    return out + bias[None, :, None, None]


if __name__ == "__main__":
    key = jax.random.PRNGKey(0)
    k_x, k_w, k_b, k_w4 = jax.random.split(key, 4)

    N, Cin, H, W = 2, 4, 16, 16
    Cout, K = 8, 3

    x = jax.random.normal(k_x, (N, Cin, H, W), dtype=jnp.float32)
    weight = jax.random.normal(k_w, (Cout, Cin, K, K), dtype=jnp.float32) * 0.1
    bias = jax.random.normal(k_b, (Cout,), dtype=jnp.float32) * 0.1

    ref = _torch_reference(x, weight, bias, K)

    # 1) auto tile (single spatial tile for this small image), f32 end-to-end.
    out1 = jax.block_until_ready(conv2d_same(x, weight, bias, K))
    assert out1.shape == (N, Cout, H, W), out1.shape
    assert jnp.allclose(out1, ref, atol=1e-4, rtol=1e-4), "mismatch (single tile)"

    # 2) spatially tiled path: 2 halo H-tiles via pl.Element row offsets.
    out2 = jax.block_until_ready(conv2d_same(x, weight, bias, K, tile_h=8))
    assert jnp.allclose(out2, ref, atol=1e-4, rtol=1e-4), "mismatch (tiled halo)"

    # 3) bf16 MXU operands with f32 accumulation (looser tolerance).
    out3 = jax.block_until_ready(
        conv2d_same(x, weight, bias, K, tile_h=8, mxu_dtype=jnp.bfloat16))
    assert jnp.allclose(out3, ref, atol=5e-2, rtol=5e-2), "mismatch (bf16 MXU)"

    # 4) even kernel size (asymmetric reflection pad path, K=4).
    K4 = 4
    weight4 = jax.random.normal(k_w4, (Cout, Cin, K4, K4), dtype=jnp.float32) * 0.1
    out4 = jax.block_until_ready(conv2d_same(x, weight4, bias, K4))
    ref4 = _torch_reference(x, weight4, bias, K4)
    assert out4.shape == (N, Cout, H, W), out4.shape
    assert jnp.allclose(out4, ref4, atol=1e-4, rtol=1e-4), "mismatch (even K)"

    print("KERNEL_OK")
</pallas_src>

<mosaic_0001>
module attributes {stable_mosaic.version = 11 : i64} {
  func.func @_conv_same_kernel(%arg0: i32, %arg1: i32, %arg2: memref<1x4x18x18xf32, #tpu.memory_space<vmem>>, %arg3: memref<8x36xf32, #tpu.memory_space<vmem>>, %arg4: memref<8x1xf32, #tpu.memory_space<vmem>>, %arg5: memref<1x8x256xf32, #tpu.memory_space<vmem>>) attributes {dimension_semantics = [#tpu.dimension_semantics<parallel>, #tpu.dimension_semantics<parallel>], iteration_bounds = array<i64: 2, 1>, scalar_prefetch = 0 : i64, scratch_operands = 0 : i64, tpu.core_type = #tpu.core_type<tc>, window_params = [{transform_indices = @transform_0, window_bounds = array<i64: 1, 4, 18, 18>}, {pipeline_mode = #tpu.pipeline_mode<synchronous>, transform_indices = @transform_1, window_bounds = array<i64: 8, 36>}, {pipeline_mode = #tpu.pipeline_mode<synchronous>, transform_indices = @transform_2, window_bounds = array<i64: 8, 1>}, {transform_indices = @transform_3, window_bounds = array<i64: 1, 8, 256>}]} {
    %c0 = arith.constant 0 : index
    %c0_0 = arith.constant 0 : index
    %c0_1 = arith.constant 0 : index
    %c0_2 = arith.constant 0 : index
    %0 = vector.load %arg2[%c0, %c0_0, %c0_1, %c0_2] : memref<1x4x18x18xf32, #tpu.memory_space<vmem>>, vector<1x4x18x18xf32>
    %1 = vector.shape_cast %0 : vector<1x4x18x18xf32> to vector<4x18x18xf32>
    %2 = vector.extract_strided_slice %1 {offsets = [0, 0, 0], sizes = [4, 16, 16], strides = [1, 1, 1]} : vector<4x18x18xf32> to vector<4x16x16xf32>
    %3 = vector.extract_strided_slice %1 {offsets = [0, 0, 1], sizes = [4, 16, 16], strides = [1, 1, 1]} : vector<4x18x18xf32> to vector<4x16x16xf32>
    %4 = vector.extract_strided_slice %1 {offsets = [0, 0, 2], sizes = [4, 16, 16], strides = [1, 1, 1]} : vector<4x18x18xf32> to vector<4x16x16xf32>
    %5 = vector.extract_strided_slice %1 {offsets = [0, 1, 0], sizes = [4, 16, 16], strides = [1, 1, 1]} : vector<4x18x18xf32> to vector<4x16x16xf32>
    %6 = vector.extract_strided_slice %1 {offsets = [0, 1, 1], sizes = [4, 16, 16], strides = [1, 1, 1]} : vector<4x18x18xf32> to vector<4x16x16xf32>
    %7 = vector.extract_strided_slice %1 {offsets = [0, 1, 2], sizes = [4, 16, 16], strides = [1, 1, 1]} : vector<4x18x18xf32> to vector<4x16x16xf32>
    %8 = vector.extract_strided_slice %1 {offsets = [0, 2, 0], sizes = [4, 16, 16], strides = [1, 1, 1]} : vector<4x18x18xf32> to vector<4x16x16xf32>
    %9 = vector.extract_strided_slice %1 {offsets = [0, 2, 1], sizes = [4, 16, 16], strides = [1, 1, 1]} : vector<4x18x18xf32> to vector<4x16x16xf32>
    %10 = vector.extract_strided_slice %1 {offsets = [0, 2, 2], sizes = [4, 16, 16], strides = [1, 1, 1]} : vector<4x18x18xf32> to vector<4x16x16xf32>
    %11 = tpu.concatenate %2, %3, %4, %5, %6, %7, %8, %9, %10 in 0 : vector<4x16x16xf32>, vector<4x16x16xf32>, vector<4x16x16xf32>, vector<4x16x16xf32>, vector<4x16x16xf32>, vector<4x16x16xf32>, vector<4x16x16xf32>, vector<4x16x16xf32>, vector<4x16x16xf32> -> vector<36x16x16xf32>
    %12 = vector.shape_cast %11 : vector<36x16x16xf32> to vector<36x256xf32>
    %c0_3 = arith.constant 0 : index
    %c0_4 = arith.constant 0 : index
    %13 = vector.load %arg3[%c0_3, %c0_4] : memref<8x36xf32, #tpu.memory_space<vmem>>, vector<8x36xf32>
    %cst = arith.constant dense<0.000000e+00> : vector<8x256xf32>
    %14 = tpu.matmul %13, %12, %cst {dimension_numbers = #tpu.dot_dimension_numbers<[1], [0], [0], [1], [0, 0, 1, 1], [], []>} : vector<8x36xf32>, vector<36x256xf32>, vector<8x256xf32> -> vector<8x256xf32>
    %c0_5 = arith.constant 0 : index
    %c0_6 = arith.constant 0 : index
    %15 = vector.load %arg4[%c0_5, %c0_6] : memref<8x1xf32, #tpu.memory_space<vmem>>, vector<8x1xf32>
    %16 = vector.broadcast %15 : vector<8x1xf32> to vector<8x256xf32>
    %17 = arith.addf %14, %16 : vector<8x256xf32>
    %c0_7 = arith.constant 0 : index
    %c0_8 = arith.constant 0 : index
    %c0_9 = arith.constant 0 : index
    %18 = vector.load %arg5[%c0_7, %c0_8, %c0_9] : memref<1x8x256xf32, #tpu.memory_space<vmem>>, vector<1x8x256xf32>
    %19 = vector.shape_cast %18 : vector<1x8x256xf32> to vector<8x256xf32>
    %20 = vector.shape_cast %17 : vector<8x256xf32> to vector<1x8x256xf32>
    tpu.vector_store %arg5[%c0_7, %c0_8, %c0_9], %20 {strides = array<i32>} : memref<1x8x256xf32, #tpu.memory_space<vmem>>, vector<1x8x256xf32>,
    return
  }
  func.func @transform_0(%arg0: i32, %arg1: i32) -> (i32, i32, i32, i32) {
    %c0_i32 = arith.constant 0 : i32
    %c0_i32_0 = arith.constant 0 : i32
    %c0_i32_1 = arith.constant 0 : i32
    %c0_i32_2 = arith.constant 0 : i32
    return %arg0, %c0_i32, %c0_i32_0, %c0_i32_1 : i32, i32, i32, i32
  }
  func.func @transform_1(%arg0: i32, %arg1: i32) -> (i32, i32) {
    %c0_i32 = arith.constant 0 : i32
    %c0_i32_0 = arith.constant 0 : i32
    %c0_i32_1 = arith.constant 0 : i32
    return %c0_i32, %c0_i32_0 : i32, i32
  }
  func.func @transform_2(%arg0: i32, %arg1: i32) -> (i32, i32) {
    %c0_i32 = arith.constant 0 : i32
    %c0_i32_0 = arith.constant 0 : i32
    %c0_i32_1 = arith.constant 0 : i32
    return %c0_i32, %c0_i32_0 : i32, i32
  }
  func.func @transform_3(%arg0: i32, %arg1: i32) -> (i32, i32, i32) {
    %c0_i32 = arith.constant 0 : i32
    %c0_i32_0 = arith.constant 0 : i32
    return %arg0, %c0_i32, %arg1 : i32, i32, i32
  }
}

</mosaic_0001>

<bundles_post_ra>
// kernel: tpu_custom_call.1
= control target key start
LH: loop header
LB: loop body
LE: loop exit
PB: predicated region body
PF: predicated region fallthrough
CT: control target
= control target key end

     0   :  { %8 = vsyncpa [#allocation3], 0  ;;  %s3605_s0 = inlined_call_operand.vmem [shape: f32[2,4,18,18], index: 0, kind: input, shape index: {}]   ;;  %s3606_s1 = inlined_call_operand.vmem [shape: f32[8,36], index: 1, kind: input, shape index: {}]   ;;  %s3607_s2 = inlined_call_operand.vmem [shape: f32[8,1], index: 2, kind: input, shape index: {}]   ;;  %s3608_s3 = inlined_call_operand.hbm [shape: f32[2,8,256], index: 3, kind: output, shape index: {}]  }
   0x1   :  { %10 = vsyncpa [#allocation3 + $0x1], 0  ;;  %s2375_s12 = smov 0   ;;  %s2377_s13 = smov 0  }
   0x2   :  { %s2379_s14 = smov 0   ;;  %s2381_s15 = smov 0  }
   0x3   :  { %s2383_s16 = smov 0   ;;  %s2385_s17 = smov 0  }
   0x4 LB: > { %s2169_s18 = sadd.s32 4294967295, %s2339_s17   ;;  %s2170_s19 = sadd.s32 4294967294, %s2339_s17   ;;  %s2339_s17 = sphi %s2385_s17, %s16_s17   ;;  %s2335_s16 = sphi %s2383_s16, %s3729_s16   ;;  %s2331_s15 = sphi %s2381_s15, %s3728_s15   ;;  %s2327_s14 = sphi %s2379_s14, %s3727_s14   ;;  %s2323_s13 = sphi %s2377_s13, %s3726_s13   ;;  %s2319_s12 = sphi %s2375_s12, %s3725_s12  }
   0x5   : > { %s28_s20 = sadd.s32 1, %s2335_s16  ;;  %s105_s21 = sadd.s32 1, %s2327_s14 }
   0x6   : > { %p30_p0 = scmp.ge.s32.totalorder %s28_s20, 2  ;;  %p115_p1 = scmp.ne.s32.totalorder %s2327_s14, %s2323_s13 }
   0x7   : > { %p116_p2 = scmp.eq.s32.totalorder %s2169_s18, 1  ;;  %p121_p3 = scmp.ne.s32.totalorder %s2323_s13, %s2319_s12 }
   0x8   : > { %s3731_s20 = smov (%p30_p0, %s28_s20), 0  ;;  %p122_p5 = scmp.eq.s32.totalorder %s2170_s19, 1 }
   0x9   : > { %p2415_p4 = por %p116_p2, %p115_p1  ;;  %s100_s23 = ssub.s32 %s2335_s16, %s3731_s20 }
   0xa   : > { %p2173_p6 = scmp.ge.s32.totalorder %s2339_s17, 1  ;;  %p103_p7 = scmp.eq.s32.totalorder %s100_s23, 0 }
   0xb   : > { %p2422_p8 = por %p122_p5, %p121_p3  ;;  %p154_p9 = scmp.lt.s32.totalorder %s2339_s17, 3 }
   0xc   : > { %s2428_s25 = scalar_select %p103_p7, %s2327_s14, %s105_s21  }
   0xd   : > { %p155_p10 = pnand %p2173_p6, %p154_p9 }
   0xf   : > { %158 = sbr.rel (%p155_p10) target bundleno = 652 (0x28c), region = 32 }
  0x14   : > { %p178_p11 = scmp.lt.s32.totalorder %s2331_s15, 1  ;;  %vm333_vm0 = vcmask 1045504   ;;  %v415_v3 = vlaneseq  ;;  %v2341_v10 = vmov 1983009808   ;;  %s2342_s4 = smov 126   ;;  %vm256_vm1 = vcmask 1046528  }
  0x15   : > { %v413_v11 = vunpack.c.l.s4 %v2341_v10  ;;  %s2344_s5 = smov 127   ;;  %s2346_s6 = smov 32   ;;  %vm1914_vm2 = vcmask 130048   ;;  %vm1920_vm3 = vcmask 261120   ;;  %vm1926_vm4 = vcmask 392192  }
  0x16   : > { %s179_s26 = scalar_select %p178_p11, %s2331_s15, 1  ;;  %v2465_v22 = vshrl.u32 %v415_v3, 7  ;;  %vm1932_vm5 = vcmask 523264   ;;  %vm1938_vm6 = vcmask 654336   ;;  %vm1944_vm7 = vcmask 785408  }
  0x17   : > { %v414_v31 = vunpack.c.0.s8 %v413_v11  ;;  %s2347_s7 = smov 96   ;;  %s2348_s8 = smov 16   ;;  %vm1950_vm8 = vcmask 916480   ;;  %vm2002_vm9 = vcmask 1043456   ;;  %vm1998_vm10 = vcmask 293888  }
  0x18   : > { %s2185_s27 = smul.u32 96, %s179_s26  ;;  %s2349_s9 = smov 64  }
  0x19   : > { %v2504_v45 = vsub.s32 %v414_v31, %v2465_v22  ;;  %s2350_s10 = smov 48   ;;  %s2351_s11 = smov 80  }
  0x1a   : > { %s182_s30 = scalar_lea.vmem %s3605_s0, %s2185_s27  ;;  %s2352_s18 = smov 112  }
  0x1b   : > { %v2435_v0 = vld [vmem:[%s182_s30 + $0x38] sm:$0xff]  ;;  %v2437_v1 = vld [vmem:[%s182_s30 + $0x40] sm:$0x3]  ;;  %v2439_v2 = vld [vmem:[%s182_s30 + $0x8] sm:$0xff]  ;;  %s175_s27 = sand.u32 1, %s2323_s13   ;;  %s2184_s29 = sshll.u32 %s2331_s15, 8 }
  0x1c   : > { %3646 = vst [vmem:[#allocation5_spill] sm:$0xff] %v2439_v2  ;;  %v345_v4 = vrot.slane %v2435_v0, 2  ;;  %v347_v5 = vrot.slane %v2437_v1, 2  ;;  %v2443_v6 = vld [vmem:[%s182_s30 + $0x10] sm:$0x3]  ;;  %v335_v7 = vrot.slane %v2439_v2, 2 }
  0x1d   : > { %v2446_v8 = vld [vmem:[%s182_s30 + $0x50] sm:$0xff]  ;;  %v337_v9 = vrot.slane %v2443_v6, 2  ;;  %v195_v12 = vld [vmem:[%s182_s30 + $0x58] sm:$0x3]  ;;  %v2450_v14 = vld [vmem:[%s182_s30 + $0x20] sm:$0xff]  ;;  %v258_v48 = vrot.slane %v2439_v2, 1 }
  0x1e   : > { %3647 = vst [vmem:[#allocation6_spill] sm:$0xff] %v2446_v8  ;;  %v350_v13 = vrot.slane %v2446_v8, 2  ;;  %3648 = vst [vmem:[#allocation7_spill] sm:$0xff] %v2450_v14  ;;  %v2452_v15 = vld [vmem:[%s182_s30 + $0x18] sm:$0xff]  ;;  %v2455_v16 = vsel %vm333_vm0, %v345_v4, %v347_v5  ;;  %v352_v17 = vrot.slane %v195_v12, 2  ;;  %v340_v19 = vrot.slane %v2450_v14, 2 }
  0x1f   : > { %v189_v18 = vld [vmem:[%s182_s30 + $0x28] sm:$0x3]  ;;  %v2458_v20 = vld [vmem:[%s182_s30] sm:$0xff]  ;;  %396 = vrot.lane.b32.xlu1 %v2455_v16, %s2342_s4  ;;  %v2463_v21 = vsel %vm333_vm0, %v335_v7, %v337_v9  ;;  %v339_v24 = vrot.slane %v2452_v15, 2  ;;  %v2470_v26 = vld [vmem:[%s182_s30 + $0x30] sm:$0xff]  ;;  %v263_v39 = vrot.slane %v2450_v14, 1 }
  0x20   : > { %v342_v23 = vrot.slane %v189_v18, 2  ;;  %v2468_v25 = vld [vmem:[%s182_s30 + $0x48] sm:$0xff]  ;;  %388 = vrot.lane.b32.xlu0 %v2463_v21, %s2342_s4  ;;  %v1430_v27 = vcombine.low %v2463_v21, %v2455_v16  ;;  %v1431_v28 = vcombine.high %v2463_v21, %v2455_v16  ;;  %v2479_v29 = vsel %vm333_vm0, %v350_v13, %v352_v17  ;;  %s2174_s28 = sshll.u32 %s175_s27, 4 }
  0x21   : > { %v334_v30 = vrot.slane %v2458_v20, 2  ;;  %v349_v33 = vrot.slane %v2468_v25, 2  ;;  %v344_v34 = vrot.slane %v2470_v26, 2  ;;  %v2490_v37 = vsel %vm333_vm0, %v339_v24, %v340_v19  ;;  %s177_s30 = scalar_lea.vmem [#allocation2], %s2174_s28 }
  0x22   : > { %v343_v32 = vsel %vm333_vm0, %v340_v19, %v342_v23  ;;  %v265_v40 = vrot.slane %v189_v18, 1  ;;  %v260_v49 = vrot.slane %v2443_v6, 1  ;;  %v273_v50 = vrot.slane %v2446_v8, 1 }
  0x23   : > { %v1446_v35 = vcombine.low %v343_v32, %v2479_v29  ;;  %v1447_v36 = vcombine.high %v343_v32, %v2479_v29  ;;  %400 = vrot.lane.b32.xlu1 %v2479_v29, %s2342_s4  ;;  %v2493_v38 = vsel %vm333_vm0, %v349_v33, %v350_v13  ;;  %v336_v41 = vsel %vm333_vm0, %v334_v30, %v335_v7 }
  0x24   : > { %392 = vrot.lane.b32.xlu0 %v343_v32, %s2342_s4  ;;  %v834_v42 = vcombine.low %v2490_v37, %v2493_v38  ;;  %v835_v43 = vcombine.high %v2490_v37, %v2493_v38  ;;  %v346_v44 = vsel %vm333_vm0, %v344_v34, %v345_v4  ;;  %v275_v51 = vrot.slane %v195_v12, 1 }
  0x25   : > { %v818_v46 = vcombine.low %v336_v41, %v346_v44  ;;  %v819_v47 = vcombine.high %v336_v41, %v346_v44  ;;  %v2510_v52 = vrot.slane %v1430_v27, %v2504_v45  ;;  %v2513_v53 = vrot.slane %v1446_v35, %v2504_v45 }
  0x26   : > { %v2518_v54 = vsel %vm256_vm1, %v263_v39, %v265_v40  ;;  %v268_v55 = vrot.slane %v2435_v0, 1  ;;  %v2523_v56 = vsel %vm256_vm1, %v273_v50, %v275_v51  ;;  %v270_v57 = vrot.slane %v2437_v1, 1 }
  0x27   : > { %390 = vrot.lane.b32.xlu1 %v2490_v37, %s2342_s4  ;;  %v262_v58 = vrot.slane %v2452_v15, 1  ;;  %v257_v59 = vrot.slane %v2458_v20, 1  ;;  %v1206_v60 = vcombine.low %v2518_v54, %v2523_v56  ;;  %v1207_v61 = vcombine.high %v2518_v54, %v2523_v56 }
  0x28   : > { %386 = vrot.lane.b32.xlu0 %v336_v41, %s2342_s4  ;;  %v272_v62 = vrot.slane %v2468_v25, 1  ;;  %v267_v63 = vrot.slane %v2470_v26, 1  ;;  %v2535_v3 = vrot.slane %v1431_v28, %v2504_v45  ;;  %v261_v4 = vsel %vm256_vm1, %v258_v48, %v260_v49 }
  0x29   : > { %v271_v1 = vsel %vm256_vm1, %v268_v55, %v270_v57  ;;  %v2540_v5 = vrot.slane %v1447_v36, %v2504_v45  ;;  %v2545_v9 = vsel %vm256_vm1, %v262_v58, %v263_v39  ;;  %v1494_v11 = vcombine.low %v2510_v52, %v2513_v53 }
  0x2a   : > { %v1190_v6 = vcombine.low %v261_v4, %v271_v1  ;;  %v1191_v7 = vcombine.high %v261_v4, %v271_v1  ;;  %v2549_v10 = vsel %vm256_vm1, %v272_v62, %v273_v50  ;;  %v1495_v12 = vcombine.high %v2510_v52, %v2513_v53 }
  0x2b   : > { %398 = vrot.lane.b32.xlu1 %v2493_v38, %s2342_s4  ;;  %v259_v13 = vsel %vm256_vm1, %v257_v59, %v258_v48  ;;  %v594_v17 = vcombine.low %v2545_v9, %v2549_v10  ;;  %v595_v18 = vcombine.high %v2545_v9, %v2549_v10  ;;  %v269_v19 = vsel %vm256_vm1, %v267_v63, %v268_v55 }
  0x2c   : > { %394 = vrot.lane.b32.xlu0 %v346_v44, %s2342_s4  ;;  %v3609_v23 = vmov 0.0   ;;  %v578_v24 = vcombine.low %v259_v13, %v269_v19  ;;  %v579_v27 = vcombine.high %v259_v13, %v269_v19  ;;  %v2563_v28 = vrot.slane %v834_v42, %v2504_v45 }
  0x2d   : > { %2073 = vmatprep.mubr.f32.mxu0 %v3609_v23  ;;  %v2566_v30 = vrot.slane %v818_v46, %v2504_v45  ;;  %v2574_v34 = vrot.slane %v835_v43, %v2504_v45  ;;  %v2577_v35 = vrot.slane %v819_v47, %v2504_v45  ;;  %v2667_v48 = vrot.slane %v595_v18, %v2504_v45 }
  0x2e   : > { %v2648_v42 = vrot.slane %v578_v24, %v2504_v45  ;;  %v2670_v49 = vrot.slane %v579_v27, %v2504_v45 }
  0x2f   : > { %368 = vrot.lane.b32.xlu1 %v343_v32, %s2344_s5  ;;  %3649 = vst [vmem:[#allocation8_spill] sm:$0xff] %v2574_v34  ;;  %3650 = vst [vmem:[#allocation9_spill] sm:$0xff] %v2577_v35  ;;  %v882_v32 = vcombine.low %v2566_v30, %v2563_v28  ;;  %v883_v36 = vcombine.high %v2566_v30, %v2563_v28 }
  0x30   : > { %364 = vrot.lane.b32.xlu0 %v2463_v21, %s2344_s5  ;;  %v2623_v21 = vrot.slane %v1190_v6, %v2504_v45  ;;  %3653 = vst [vmem:[#allocation12_spill] sm:$0xff] %v2667_v48  ;;  %3654 = vst [vmem:[#allocation13_spill] sm:$0xff] %v2670_v49 }
  0x33   : > { %376 = vrot.lane.b32.xlu1 %v2479_v29, %s2344_s5 }
  0x34   : > { %372 = vrot.lane.b32.xlu0 %v2455_v16, %s2344_s5  ;;  %v2620_v16 = vrot.slane %v1206_v60, %v2504_v45 }
  0x37   : > { %366 = vrot.lane.b32.xlu1 %v2490_v37, %s2344_s5  ;;  %v2639_v37 = vrot.slane %v1207_v61, %v2504_v45 }
  0x38   : > { %362 = vrot.lane.b32.xlu0 %v336_v41, %s2344_s5  ;;  %v2645_v41 = vrot.slane %v594_v17, %v2504_v45 }
  0x39   : > { %3651 = vst [vmem:[#allocation10_spill] sm:$0xff] %v2639_v37 }
  0x3b   : > { %374 = vrot.lane.b32.xlu1 %v2493_v38, %s2344_s5  ;;  %v2642_v38 = vrot.slane %v1191_v7, %v2504_v45 }
  0x3c   : > { %370 = vrot.lane.b32.xlu0 %v346_v44, %s2344_s5 }
  0x3d   : > { %3652 = vst [vmem:[#allocation11_spill] sm:$0xff] %v2642_v38 }
  0x3f   : > { %291 = vrot.lane.b32.xlu1 %v2518_v54, %s2344_s5 }
  0x40   : > { %287 = vrot.lane.b32.xlu0 %v261_v4, %s2344_s5 }
  0x43   : > { %299 = vrot.lane.b32.xlu1 %v2523_v56, %s2344_s5 }
  0x44   : > { %295 = vrot.lane.b32.xlu0 %v271_v1, %s2344_s5 }
  0x47   : > { %315 = vrot.lane.b32.xlu1 %v2518_v54, %s2342_s4 }
  0x48   : > { %311 = vrot.lane.b32.xlu0 %v261_v4, %s2342_s4 }
  0x4b   : > { %323 = vrot.lane.b32.xlu1 %v2523_v56, %s2342_s4  ;;  %v2345_v56 = vmov 1934713408  }
  0x4c   : > { %319 = vrot.lane.b32.xlu0 %v271_v1, %s2342_s4  ;;  %v477_v57 = vunpack.c.l.s4 %v2345_v56 }
  0x4e   : > { %v478_v61 = vunpack.c.0.s8 %v477_v57 }
  0x4f   : > { %289 = vrot.lane.b32.xlu1 %v2545_v9, %s2344_s5 }
  0x50   : > { %285 = vrot.lane.b32.xlu0 %v259_v13, %s2344_s5 }
  0x53   : > { %297 = vrot.lane.b32.xlu1 %v2549_v10, %s2344_s5 }
  0x54   : > { %293 = vrot.lane.b32.xlu0 %v269_v19, %s2344_s5 }
  0x57   : > { %313 = vrot.lane.b32.xlu1 %v2545_v9, %s2342_s4 }
  0x58   : > { %309 = vrot.lane.b32.xlu0 %v259_v13, %s2342_s4  ;;  %v2702_v13 = vsub.s32 %v478_v61, %v2465_v22 }
  0x5b   : > { %321 = vrot.lane.b32.xlu1 %v2549_v10, %s2342_s4 }
  0x5c   : > { %317 = vrot.lane.b32.xlu0 %v269_v19, %s2342_s4 }
  0x5f   : > { %234 = vrot.lane.b32.xlu1 %v2450_v14, %s2342_s4 }
  0x60   : > { %230 = vrot.lane.b32.xlu0 %v2439_v2, %s2342_s4 }
  0x63   : > { %242 = vrot.lane.b32.xlu1 %v2446_v8, %s2342_s4 }
  0x64   : > { %238 = vrot.lane.b32.xlu0 %v2435_v0, %s2342_s4 }
  0x67   : > { %232 = vrot.lane.b32.xlu1 %v2452_v15, %s2342_s4 }
  0x68   : > { %228 = vrot.lane.b32.xlu0 %v2458_v20, %s2342_s4 }
  0x6b   : > { %240 = vrot.lane.b32.xlu1 %v2468_v25, %s2342_s4 }
  0x6c   : > { %236 = vrot.lane.b32.xlu0 %v2470_v26, %s2342_s4  ;;  %s2099_s4 = sshll.u32 %s177_s30, 4  ;;  %s2100_s4 = int_to_ptr.vmem [resolvable:$true] %s2099_s4 }
  0x6f   : > { %210 = vrot.lane.b32.xlu1 %v2450_v14, %s2344_s5 }
  0x70   : > { %206 = vrot.lane.b32.xlu0 %v2439_v2, %s2344_s5 }
  0x73   : > { %218 = vrot.lane.b32.xlu1 %v2446_v8, %s2344_s5 }
  0x74   : > { %214 = vrot.lane.b32.xlu0 %v2435_v0, %s2344_s5 }
  0x77   : > { %208 = vrot.lane.b32.xlu1 %v2452_v15, %s2344_s5 }
  0x78   : > { %204 = vrot.lane.b32.xlu0 %v2458_v20, %s2344_s5 }
  0x7b   : > { %216 = vrot.lane.b32.xlu1 %v2468_v25, %s2344_s5 }
  0x7c   : > { %212 = vrot.lane.b32.xlu0 %v2470_v26, %s2344_s5 }
  0x91   : > { %v397_v55 = vpop.permute.xlu1 %396 }
  0x92   : > { %v389_v58 = vpop.permute.xlu0 %388 }
  0x93   : > { %v1566_v59 = vcombine.low %v389_v58, %v397_v55  ;;  %v1567_v62 = vcombine.high %v389_v58, %v397_v55 }
  0x95   : > { %v401_v60 = vpop.permute.xlu1 %400  ;;  %v1574_v6 = vrot.slane %v1566_v59, %v2504_v45  ;;  %v1581_v17 = vrot.slane %v1567_v62, %v2504_v45 }
  0x96   : > { %v393_v63 = vpop.permute.xlu0 %392 }
  0x97   : > { %v1582_v4 = vcombine.low %v393_v63, %v401_v60  ;;  %v1583_v1 = vcombine.high %v393_v63, %v401_v60 }
  0x99   : > { %v1590_v7 = vrot.slane %v1582_v4, %v2504_v45  ;;  %v1597_v9 = vrot.slane %v1583_v1, %v2504_v45  ;;  %v391_v10 = vpop.permute.xlu1 %390 }
  0x9a   : > { %v387_v18 = vpop.permute.xlu0 %386 }
  0x9b   : > { %v1599_v19 = vcombine.high %v1574_v6, %v1590_v7  ;;  %v1615_v24 = vcombine.high %v1581_v17, %v1597_v9  ;;  %v1598_v27 = vcombine.low %v1574_v6, %v1590_v7 }
  0x9d   : > { %v399_v55 = vpop.permute.xlu1 %398  ;;  %v1613_v56 = vrot.slane %v1599_v19, %v2702_v13  ;;  %v2709_v22 = vrot.slane %v1615_v24, %v2702_v13  ;;  %v2715_v1 = vrot.slane %v1598_v27, %v2702_v13  ;;  %v1614_v19 = vcombine.low %v1581_v17, %v1597_v9 }
  0x9e   : > { %v970_v57 = vcombine.low %v391_v10, %v399_v55  ;;  %v395_v58 = vpop.permute.xlu0 %394  ;;  %v971_v61 = vcombine.high %v391_v10, %v399_v55 }
  0x9f   : > { %v954_v59 = vcombine.low %v387_v18, %v395_v58  ;;  %1807 = vrot.lane.b32.xlu0 %v1613_v56, %s2346_s6  ;;  %v955_v62 = vcombine.high %v387_v18, %v395_v58  ;;  %3655 = vst [vmem:[#allocation14_spill] sm:$0xff] %v2715_v1  ;;  %v1630_v27 = vcombine.high %v2715_v1, %v3609_v23 }
  0xa0   : > { %v978_v60 = vrot.slane %v970_v57, %v2504_v45  ;;  %v2722_v24 = vrot.slane %v971_v61, %v2504_v45 }
  0xa1   : > { %v962_v63 = vrot.slane %v954_v59, %v2504_v45  ;;  %v2712_v4 = vpop.permute.xlu1 %368  ;;  %v2725_v10 = vrot.slane %v955_v62, %v2504_v45 }
  0xa2   : > { %v2717_v6 = vpop.permute.xlu0 %364 }
  0xa3   : > { %1887 = vrot.lane.b32.xlu0 %v2709_v22, %s2347_s7  ;;  %v987_v7 = vcombine.high %v962_v63, %v978_v60  ;;  %v986_v59 = vcombine.low %v962_v63, %v978_v60  ;;  %v1002_v54 = vcombine.low %v2725_v10, %v2722_v24  ;;  %v2757_v60 = vrot.slane %v1494_v11, %v2702_v13 }
  0xa5   : > { %v2727_v18 = vpop.permute.xlu1 %376  ;;  %v1001_v55 = vrot.slane %v987_v7, %v2702_v13  ;;  %v2745_v7 = vrot.slane %v1614_v19, %v2702_v13  ;;  %3656 = vst [vmem:[#allocation15_spill] sm:$0xff] %v2757_v60  ;;  %v2762_v19 = vrot.slane %v1002_v54, %v2702_v13 }
  0xa6   : > { %v1478_v57 = vcombine.low %v2712_v4, %v2727_v18  ;;  %v2734_v58 = vpop.permute.xlu0 %372 }
  0xa7   : > { %v1462_v9 = vcombine.low %v2717_v6, %v2734_v58  ;;  %1667 = vrot.lane.b32.xlu1 %v1001_v55, %s2346_s6  ;;  %1787 = vrot.lane.b32.xlu0 %v1630_v27, %s2348_s8 }
  0xa8   : > { %v1486_v17 = vrot.slane %v1478_v57, %v2504_v45  ;;  %v2768_v57 = vrot.slane %v986_v59, %v2702_v13 }
  0xa9   : > { %v1470_v61 = vrot.slane %v1462_v9, %v2504_v45  ;;  %v2742_v62 = vpop.permute.xlu1 %366 }
  0xaa   : > { %v2749_v47 = vpop.permute.xlu0 %362  ;;  %3658 = vst [vmem:[#allocation17_spill] sm:$0xff] %v2768_v57  ;;  %v1018_v50 = vcombine.high %v2768_v57, %v3609_v23 }
  0xab   : > { %v1526_v46 = vcombine.low %v1470_v61, %v1486_v17  ;;  %1847 = vrot.lane.b32.xlu1 %v2745_v7, %s2349_s9  ;;  %v1527_v44 = vcombine.high %v1470_v61, %v1486_v17  ;;  %v1019_v61 = vcombine.high %v1001_v55, %v3609_v23 }
  0xad   : > { %v2759_v63 = vpop.permute.xlu1 %374  ;;  %v2765_v27 = vrot.slane %v1526_v46, %v2702_v13  ;;  %v1541_v17 = vrot.slane %v1527_v44, %v2702_v13 }
  0xae   : > { %v866_v9 = vcombine.low %v2742_v62, %v2759_v63  ;;  %v2772_v51 = vpop.permute.xlu0 %370 }
  0xaf   : > { %3657 = vst [vmem:[#allocation16_spill] sm:$0xff] %v2765_v27  ;;  %v850_v11 = vcombine.low %v2749_v47, %v2772_v51  ;;  %1707 = vrot.lane.b32.xlu1 %v2762_v19, %s2349_s9  ;;  %v1559_v54 = vcombine.high %v2757_v60, %v2765_v27  ;;  %v3665_v27 = vmov 0.0  }
  0xb0   : > { %v874_v46 = vrot.slane %v866_v9, %v2504_v45  ;;  %v2796_v9 = vrot.slane %v882_v32, %v2702_v13  ;;  %v1509_v32 = vrot.slane %v1495_v12, %v2702_v13  ;;  %v897_v12 = vrot.slane %v883_v36, %v2702_v13 }
  0xb1   : > { %v858_v40 = vrot.slane %v850_v11, %v2504_v45  ;;  %1785 = vrot.lane.b32.xlu0 %v1559_v54, %s2348_s8  ;;  %v2783_v59 = vpop.permute.xlu1 %291  ;;  %v1631_v54 = vcombine.high %v1613_v56, %v3609_v23  ;;  %v1632_v60 = vcombine.high %v2745_v7, %v3665_v27 }
  0xb2   : > { %v2787_v33 = vpop.permute.xlu0 %287  ;;  %3659 = vst [vmem:[#allocation18_spill] sm:$0xff] %v2796_v9  ;;  %v1560_v53 = vcombine.low %v1509_v32, %v1541_v17  ;;  %v1561_v23 = vcombine.high %v1509_v32, %v1541_v17 }
  0xb3   : > { %v914_v29 = vcombine.low %v858_v40, %v874_v46  ;;  %1647 = vrot.lane.b32.xlu1 %v1018_v50, %s2348_s8  ;;  %v915_v43 = vcombine.high %v858_v40, %v874_v46 }
  0xb5   : > { %v2798_v11 = vpop.permute.xlu1 %299  ;;  %v2802_v31 = vrot.slane %v914_v29, %v2702_v13  ;;  %v929_v44 = vrot.slane %v915_v43, %v2702_v13 }
  0xb6   : > { %v2804_v39 = vpop.permute.xlu0 %295  ;;  %v1310_v29 = vcombine.low %v2783_v59, %v2798_v11 }
  0xb7   : > { %3660 = vst [vmem:[#allocation19_spill] sm:$0xff] %v2802_v31  ;;  %1827 = vrot.lane.b32.xlu1 %v1631_v54, %s2350_s10  ;;  %v947_v50 = vcombine.high %v2796_v9, %v2802_v31  ;;  %v1294_v56 = vcombine.low %v2787_v33, %v2804_v39  ;;  %v948_v30 = vcombine.low %v897_v12, %v929_v44 }
  0xb8   : > { %v1318_v54 = vrot.slane %v1310_v29, %v2504_v45 }
  0xb9   : > { %1645 = vrot.lane.b32.xlu0 %v947_v50, %s2348_s8  ;;  %v2819_v40 = vpop.permute.xlu1 %315  ;;  %v1302_v50 = vrot.slane %v1294_v56, %v2504_v45 }
  0xba   : > { %v2822_v46 = vpop.permute.xlu0 %311 }
  0xbb   : > { %1687 = vrot.lane.b32.xlu1 %v1019_v61, %s2350_s10  ;;  %v1358_v43 = vcombine.low %v1302_v50, %v1318_v54  ;;  %v1359_v37 = vcombine.high %v1302_v50, %v1318_v54 }
  0xbd   : > { %1805 = vrot.lane.b32.xlu0 %v1560_v53, %s2346_s6  ;;  %v2835_v55 = vpop.permute.xlu1 %323  ;;  %v2854_v57 = vrot.slane %v1358_v43, %v2702_v13 }
  0xbe   : > { %v1342_v61 = vcombine.low %v2819_v40, %v2835_v55  ;;  %v2839_v52 = vpop.permute.xlu0 %319 }
  0xbf   : > { %v1326_v28 = vcombine.low %v2822_v46, %v2839_v52  ;;  %1825 = vrot.lane.b32.xlu1 %v1561_v23, %s2350_s10  ;;  %3661 = vst [vmem:[#allocation20_spill] sm:$0xff] %v2854_v57 }
  0xc0   : > { %v1350_v36 = vrot.slane %v1342_v61, %v2504_v45  ;;  %v867_v61 = vcombine.high %v2742_v62, %v2759_v63 }
  0xc1   : > { %v1334_v29 = vrot.slane %v1326_v28, %v2504_v45  ;;  %1665 = vrot.lane.b32.xlu0 %v948_v30, %s2346_s6  ;;  %v2847_v56 = vpop.permute.xlu1 %289  ;;  %v851_v28 = vcombine.high %v2749_v47, %v2772_v51 }
  0xc2   : > { %v2849_v32 = vpop.permute.xlu0 %285  ;;  %v2879_v47 = vrot.slane %v867_v61, %v2504_v45  ;;  %v1479_v61 = vcombine.high %v2712_v4, %v2727_v18 }
  0xc3   : > { %v1390_v17 = vcombine.low %v1334_v29, %v1350_v36  ;;  %v2882_v51 = vrot.slane %v851_v28, %v2504_v45  ;;  %v1391_v63 = vcombine.high %v1334_v29, %v1350_v36  ;;  %v1463_v36 = vcombine.high %v2717_v6, %v2734_v58 }
  0xc4   : > { %3663 = vst [vmem:[#allocation22_spill] sm:$0xff] %v2879_v47  ;;  %v2918_v28 = vrot.slane %v1359_v37, %v2702_v13 }
  0xc5   : > { %v2851_v53 = vpop.permute.xlu1 %297  ;;  %v2857_v23 = vrot.slane %v1390_v17, %v2702_v13  ;;  %3664 = vst [vmem:[#allocation23_spill] sm:$0xff] %v2882_v51  ;;  %v2908_v29 = vrot.slane %v1391_v63, %v2702_v13 }
  0xc6   : > { %v2859_v1 = vpop.permute.xlu0 %293  ;;  %v698_v31 = vcombine.low %v2847_v56, %v2851_v53 }
  0xc7   : > { %3662 = vst [vmem:[#allocation21_spill] sm:$0xff] %v2857_v23  ;;  %v1423_v30 = vcombine.high %v2854_v57, %v2857_v23  ;;  %v682_v43 = vcombine.low %v2849_v32, %v2859_v1 }
  0xc9   : > { %1783 = vrot.lane.b32.xlu0 %v1423_v30, %s2348_s8  ;;  %v2872_v17 = vpop.permute.xlu1 %313  ;;  %v2887_v30 = vrot.slane %v698_v31, %v2504_v45  ;;  %v2890_v38 = vrot.slane %v682_v43, %v2504_v45  ;;  %v930_v31 = vcombine.low %v2882_v51, %v2879_v47  ;;  %v2921_v43 = vrot.slane %v1479_v61, %v2504_v45 }
  0xca   : > { %v2874_v9 = vpop.permute.xlu0 %309 }
  0xcb   : > { %v746_v6 = vcombine.low %v2890_v38, %v2887_v30  ;;  %v2937_v37 = vrot.slane %v930_v31, %v2702_v13 }
  0xcd   : > { %1867 = vrot.lane.b32.xlu0 %v1632_v60, %s2351_s11  ;;  %v2893_v62 = vpop.permute.xlu1 %321  ;;  %v949_v60 = vcombine.high %v897_v12, %v929_v44  ;;  %v3668_v44 = vcombine.low %v2577_v35, %v2574_v34  ;;  %v2943_v23 = vrot.slane %v746_v6, %v2702_v13  ;;  %v1020_v35 = vcombine.high %v2762_v19, %v3665_v27 }
  0xce   : > { %v730_v7 = vcombine.low %v2872_v17, %v2893_v62  ;;  %v2901_v54 = vpop.permute.xlu0 %317  ;;  %v1022_v19 = vcombine.low %v2439_v2, %v2435_v0 }
  0xcf   : > { %v714_v50 = vcombine.low %v2874_v9, %v2901_v54  ;;  %v2929_v63 = vrot.slane %v3668_v44, %v2702_v13  ;;  %3670 = vst [vmem:[#allocation27_spill] sm:$0xff] %v2943_v23 }
  0xd0   : > { %v738_v4 = vrot.slane %v730_v7, %v2504_v45  ;;  %v2932_v7 = vrot.slane %v1463_v36, %v2504_v45 }
  0xd1   : > { %v722_v18 = vrot.slane %v714_v50, %v2504_v45  ;;  %1685 = vrot.lane.b32.xlu0 %v949_v60, %s2350_s10  ;;  %v2915_v58 = vpop.permute.xlu1 %234  ;;  %v1424_v60 = vcombine.low %v2918_v28, %v2908_v29 }
  0xd2   : > { %3666 = vst [vmem:[#allocation24_spill] sm:$0xff] %v2915_v58  ;;  %v2923_v12 = vpop.permute.xlu0 %230  ;;  %v1542_v48 = vcombine.low %v2932_v7, %v2921_v43 }
  0xd3   : > { %3667 = vst [vmem:[#allocation25_spill] sm:$0xff] %v2923_v12  ;;  %v778_v50 = vcombine.low %v722_v18, %v738_v4 }
  0xd4   : > { %v1550_v51 = vrot.slane %v1542_v48, %v2702_v13  ;;  %v1038_v48 = vcombine.low %v2450_v14, %v2446_v8  ;;  %v1003_v8 = vcombine.high %v2725_v10, %v2722_v24  ;;  %v3675_v24 = vcombine.low %v2648_v42, %v2645_v41 }
  0xd5   : > { %1803 = vrot.lane.b32.xlu0 %v1424_v60, %s2346_s6  ;;  %v2940_v61 = vpop.permute.xlu1 %242  ;;  %v2946_v44 = vrot.slane %v778_v50, %v2702_v13  ;;  %v950_v60 = vcombine.low %v2929_v63, %v2937_v37 }
  0xd6   : > { %3669 = vst [vmem:[#allocation26_spill] sm:$0xff] %v2940_v61  ;;  %v1174_v36 = vcombine.low %v2915_v58, %v2940_v61  ;;  %v2950_v57 = vpop.permute.xlu0 %238  ;;  %v3045_v10 = vrot.slane %v3675_v24, %v2702_v13 }
  0xd7   : > { %3671 = vst [vmem:[#allocation28_spill] sm:$0xff] %v2946_v44  ;;  %3672 = vst [vmem:[#allocation29_spill] sm:$0xff] %v2950_v57  ;;  %v1158_v31 = vcombine.low %v2923_v12, %v2950_v57  ;;  %v811_v6 = vcombine.high %v2943_v23, %v2946_v44  ;;  %v3673_v12 = vcombine.low %v2535_v3, %v2540_v5 }
  0xd8   : > { %v2961_v50 = vrot.slane %v1174_v36, %v2504_v45  ;;  %v3674_v36 = vcombine.low %v2623_v21, %v2620_v16  ;;  %3676 = vst [vmem:[#allocation30_spill] sm:$0xff] %v3045_v10 }
  0xd9   : > { %v2964_v49 = vrot.slane %v1158_v31, %v2504_v45  ;;  %1705 = vrot.lane.b32.xlu0 %v950_v60, %s2349_s9  ;;  %1643 = vrot.lane.b32.xlu1 %v811_v6, %s2348_s8  ;;  %v2968_v58 = vpop.permute.xlu1 %232  ;;  %v1518_v57 = vrot.slane %v3673_v12, %v2702_v13  ;;  %v779_v60 = vcombine.high %v722_v18, %v738_v4 }
  0xda   : > { %v2970_v61 = vpop.permute.xlu0 %228  ;;  %v2980_v34 = vrot.slane %v3674_v36, %v2702_v13  ;;  %v747_v12 = vcombine.high %v2890_v38, %v2887_v30 }
  0xdb   : > { %v1222_v6 = vcombine.low %v2964_v49, %v2961_v50  ;;  %v1563_v2 = vcombine.high %v1518_v57, %v1550_v51 }
  0xdc   : > { %v3021_v23 = vrot.slane %v747_v12, %v2702_v13 }
  0xdd   : > { %1727 = vrot.lane.b32.xlu1 %v1020_v35, %s2351_s11  ;;  %v2992_v47 = vpop.permute.xlu1 %240  ;;  %v2995_v36 = vrot.slane %v1222_v6, %v2702_v13  ;;  %v1562_v35 = vcombine.low %v1518_v57, %v1550_v51  ;;  %v3010_v6 = vrot.slane %v779_v60, %v2702_v13  ;;  %v3679_v51 = vcombine.high %v2535_v3, %v2540_v5 }
  0xde   : > { %v562_v4 = vcombine.low %v2968_v58, %v2992_v47  ;;  %v2999_v18 = vpop.permute.xlu0 %236  ;;  %v1223_v3 = vcombine.high %v2964_v49, %v2961_v50  ;;  %v699_v49 = vcombine.high %v2847_v56, %v2851_v53  ;;  %v1343_v50 = vcombine.high %v2819_v40, %v2835_v55 }
  0xdf   : > { %v546_v38 = vcombine.low %v2970_v61, %v2999_v18  ;;  %v1287_v30 = vcombine.high %v2995_v36, %v2980_v34  ;;  %v3064_v24 = vrot.slane %v3679_v51, %v2702_v13  ;;  %v410_v51 = vcombine.low %v2458_v20, %v2470_v26 }
  0xe0   : > { %v3013_v31 = vrot.slane %v562_v4, %v2504_v45  ;;  %v3030_v4 = vrot.slane %v1022_v19, %v2504_v45  ;;  %v951_v56 = vcombine.high %v2929_v63, %v2937_v37  ;;  %v1425_v40 = vcombine.high %v2918_v28, %v2908_v29 }
  0xe1   : > { %v3016_v44 = vrot.slane %v546_v38, %v2504_v45  ;;  %1845 = vrot.lane.b32.xlu1 %v1562_v35, %s2349_s9  ;;  %1781 = vrot.lane.b32.xlu0 %v1287_v30, %s2348_s8  ;;  %v3023_v14 = vpop.permute.xlu1 %210  ;;  %v3033_v38 = vrot.slane %v1038_v48, %v2504_v45  ;;  %v812_v30 = vcombine.low %v3021_v23, %v3010_v6 }
  0xe2   : > { %v3027_v60 = vpop.permute.xlu0 %206  ;;  %v3678_v48 = vcombine.high %v2623_v21, %v2620_v16  ;;  %v3125_v55 = vrot.slane %v1223_v3, %v2702_v13  ;;  %v3132_v63 = vrot.slane %v410_v51, %v2504_v45  ;;  %v3140_v29 = vrot.slane %v699_v49, %v2504_v45 }
  0xe3   : > { %v610_v12 = vcombine.low %v3016_v44, %v3013_v31  ;;  %v1086_v21 = vcombine.low %v3030_v4, %v3033_v38 }
  0xe4   : > { %v3056_v35 = vrot.slane %v3678_v48, %v2702_v13  ;;  %v715_v48 = vcombine.high %v2874_v9, %v2901_v54  ;;  %v426_v9 = vcombine.low %v2452_v15, %v2468_v25  ;;  %v683_v54 = vcombine.high %v2849_v32, %v2859_v1 }
  0xe5   : > { %1663 = vrot.lane.b32.xlu1 %v812_v30, %s2346_s6  ;;  %1865 = vrot.lane.b32.xlu0 %v1563_v2, %s2351_s11  ;;  %v3050_v19 = vrot.slane %v610_v12, %v2702_v13  ;;  %v3058_v57 = vpop.permute.xlu1 %218  ;;  %v731_v2 = vcombine.high %v2872_v17, %v2893_v62  ;;  %v3069_v12 = vrot.slane %v1003_v8, %v2702_v13 }
  0xe6   : > { %v1070_v30 = vcombine.low %v3023_v14, %v3058_v57  ;;  %v3073_v16 = vpop.permute.xlu0 %214  ;;  %v1543_v17 = vcombine.high %v2932_v7, %v2921_v43  ;;  %v3135_v37 = vrot.slane %v426_v9, %v2504_v45  ;;  %v3143_v28 = vrot.slane %v683_v54, %v2504_v45 }
  0xe7   : > { %3677 = vst [vmem:[#allocation31_spill] sm:$0xff] %v3050_v19  ;;  %v675_v5 = vcombine.high %v3050_v19, %v3045_v10  ;;  %v1054_v8 = vcombine.low %v3027_v60, %v3073_v16  ;;  %v3117_v53 = vrot.slane %v731_v2, %v2504_v45  ;;  %v1295_v2 = vcombine.high %v2787_v33, %v2804_v39 }
  0xe8   : > { %v3088_v62 = vrot.slane %v1070_v30, %v2504_v45  ;;  %v1327_v30 = vcombine.high %v2822_v46, %v2839_v52  ;;  %v1311_v46 = vcombine.high %v2783_v59, %v2798_v11  ;;  %v3150_v11 = vrot.slane %v1343_v50, %v2504_v45 }
  0xe9   : > { %1747 = vrot.lane.b32.xlu1 %v3069_v12, %s2347_s7  ;;  %1641 = vrot.lane.b32.xlu0 %v675_v5, %s2348_s8  ;;  %v3102_v43 = vrot.slane %v1054_v8, %v2504_v45  ;;  %v3104_v7 = vpop.permute.xlu1 %208  ;;  %v3120_v5 = vrot.slane %v715_v48, %v2504_v45  ;;  %v1633_v48 = vcombine.high %v2709_v22, %v3665_v27 }
  0xea   : > { %v3112_v1 = vpop.permute.xlu0 %204  ;;  %v3155_v33 = vrot.slane %v1543_v17, %v2702_v13  ;;  %v3162_v8 = vrot.slane %v1327_v30, %v2504_v45  ;;  %v1288_v9 = vcombine.low %v3125_v55, %v3056_v35  ;;  %v3171_v17 = vrot.slane %v1311_v46, %v2504_v45 }
  0xeb   : > { %v1118_v52 = vcombine.low %v3102_v43, %v3088_v62  ;;  %v794_v51 = vcombine.low %v3120_v5, %v3117_v53  ;;  %v3177_v54 = vrot.slane %v1086_v21, %v2702_v13  ;;  %v3183_v30 = vrot.slane %v1295_v2, %v2504_v45 }
  0xec   : > { %v1564_v21 = vcombine.low %v3064_v24, %v3155_v33  ;;  %v474_v46 = vcombine.low %v3132_v63, %v3135_v37  ;;  %v1406_v2 = vcombine.low %v3162_v8, %v3150_v11 }
  0xed   : > { %1823 = vrot.lane.b32.xlu1 %v1425_v40, %s2350_s10  ;;  %1725 = vrot.lane.b32.xlu0 %v951_v56, %s2351_s11  ;;  %v3147_v59 = vpop.permute.xlu1 %216  ;;  %3680 = vst [vmem:[#allocation32_spill] sm:$0xff] %v3177_v54  ;;  %v3180_v50 = vrot.slane %v1118_v52, %v2702_v13  ;;  %v762_v56 = vcombine.low %v3143_v28, %v3140_v29 }
  0xee   : > { %v458_v39 = vcombine.low %v3104_v7, %v3147_v59  ;;  %v3159_v3 = vpop.permute.xlu0 %212  ;;  %v3211_v32 = vrot.slane %v474_v46, %v2702_v13  ;;  %v1414_v19 = vrot.slane %v1406_v2, %v2702_v13 }
  0xef   : > { %v442_v22 = vcombine.low %v3112_v1, %v3159_v3  ;;  %3681 = vst [vmem:[#allocation33_spill] sm:$0xff] %v3180_v50  ;;  %v770_v52 = vrot.slane %v762_v56, %v2702_v13  ;;  %v1151_v46 = vcombine.high %v3177_v54, %v3180_v50 }
  0xf0   : > { %v3174_v49 = vrot.slane %v458_v39, %v2504_v45  ;;  %v802_v39 = vrot.slane %v794_v51, %v2702_v13 }
  0xf1   : > { %1907 = vrot.lane.b32.xlu1 %v1633_v48, %s2352_s18  ;;  %1801 = vrot.lane.b32.xlu0 %v1288_v9, %s2346_s6  ;;  %v3190_v40 = vrot.slane %v442_v22, %v2504_v45  ;;  %v813_v48 = vcombine.high %v3021_v23, %v3010_v6  ;;  %v1374_v22 = vcombine.low %v3183_v30, %v3171_v17 }
  0xf2   : > { %v611_v23 = vcombine.high %v3016_v44, %v3013_v31  ;;  %v1021_v6 = vcombine.high %v3069_v12, %v3665_v27  ;;  %v814_v51 = vcombine.low %v770_v52, %v802_v39  ;;  %v3683_v44 = vld [vmem:[#allocation23_spill] sm:$0xff]  ;;  %v3684_v12 = vcombine.high %v2648_v42, %v2645_v41 }
  0xf3   : > { %v506_v9 = vcombine.low %v3190_v40, %v3174_v49  ;;  %v1382_v56 = vrot.slane %v1374_v22, %v2702_v13  ;;  %v1087_v42 = vcombine.high %v3030_v4, %v3033_v38  ;;  %v3688_v4 = vld [vmem:[#allocation26_spill] sm:$0xff]  ;;  %v3689_v38 = vld [vmem:[#allocation24_spill] sm:$0xff] }
  0xf4   : > { %v625_v27 = vrot.slane %v611_v23, %v2702_v13  ;;  %v657_v2 = vrot.slane %v3684_v12, %v2702_v13  ;;  %v547_v23 = vcombine.high %v2970_v61, %v2999_v18  ;;  %v815_v61 = vcombine.high %v770_v52, %v802_v39 }
  0xf5   : > { %1683 = vrot.lane.b32.xlu1 %v813_v48, %s2350_s10  ;;  %1885 = vrot.lane.b32.xlu0 %v1564_v21, %s2347_s7  ;;  %v3214_v10 = vrot.slane %v506_v9, %v2702_v13  ;;  %v3682_v48 = vld [vmem:[#allocation22_spill] sm:$0xff]  ;;  %v1426_v9 = vcombine.low %v1382_v56, %v1414_v19  ;;  %v1427_v22 = vcombine.high %v1382_v56, %v1414_v19  ;;  %v3686_v21 = vld [vmem:[#allocation8_spill] sm:$0xff] }
  0xf6   : > { %v931_v31 = vcombine.high %v3683_v44, %v3682_v48  ;;  %v563_v19 = vcombine.high %v2968_v58, %v2992_v47  ;;  %v1101_v56 = vrot.slane %v1087_v42, %v2702_v13  ;;  %v1175_v44 = vcombine.high %v3689_v38, %v3688_v4  ;;  %v3690_v47 = vld [vmem:[#allocation29_spill] sm:$0xff]  ;;  %v3693_v42 = vld [vmem:[#allocation12_spill] sm:$0xff] }
  0xf7   : > { %v539_v41 = vcombine.high %v3211_v32, %v3214_v10  ;;  %v3691_v58 = vld [vmem:[#allocation25_spill] sm:$0xff]  ;;  %v475_v4 = vcombine.high %v3132_v63, %v3135_v37 }
  0xf8   : > { %v945_v48 = vrot.slane %v931_v31, %v2702_v13  ;;  %v1159_v31 = vcombine.high %v3691_v58, %v3690_v47  ;;  %v3264_v18 = vrot.slane %v563_v19, %v2504_v45  ;;  %v3695_v19 = vld [vmem:[#allocation5_spill] sm:$0xff] }
  0xf9   : > { %1767 = vrot.lane.b32.xlu1 %v1021_v6, %s2352_s18  ;;  %1703 = vrot.lane.b32.xlu0 %v814_v51, %s2349_s9  ;;  %v676_v6 = vcombine.low %v625_v27, %v657_v2  ;;  %v3685_v51 = vld [vmem:[#allocation9_spill] sm:$0xff] }
  0xfa   : > { %v3687_v50 = vcombine.high %v3685_v51, %v3686_v21  ;;  %v3280_v52 = vrot.slane %v1159_v31, %v2504_v45  ;;  %v507_v31 = vcombine.high %v3190_v40, %v3174_v49  ;;  %v795_v49 = vcombine.high %v3120_v5, %v3117_v53 }
  0xfc   : > { %v913_v54 = vrot.slane %v3687_v50, %v2702_v13  ;;  %v1119_v50 = vcombine.high %v3102_v43, %v3088_v62  ;;  %v3267_v62 = vrot.slane %v547_v23, %v2504_v45  ;;  %v1289_v43 = vcombine.high %v3125_v55, %v3056_v35 }
  0xfd   : > { %1843 = vrot.lane.b32.xlu1 %v1426_v9, %s2349_s9  ;;  %1779 = vrot.lane.b32.xlu0 %v1151_v46, %s2348_s8  ;;  %v1407_v46 = vcombine.high %v3162_v8, %v3150_v11  ;;  %v1375_v11 = vcombine.high %v3183_v30, %v3171_v17  ;;  %v3277_v8 = vrot.slane %v1175_v44, %v2504_v45  ;;  %v3699_v44 = vld [vmem:[#allocation10_spill] sm:$0xff] }
  0xfe   : > { %v952_v21 = vcombine.low %v913_v54, %v945_v48  ;;  %v1133_v9 = vrot.slane %v1119_v50, %v2702_v13  ;;  %v626_v39 = vcombine.low %v3267_v62, %v3264_v18  ;;  %v1565_v35 = vcombine.high %v3064_v24, %v3155_v33  ;;  %v3696_v50 = vld [vmem:[#allocation6_spill] sm:$0xff] }
  0xff   : > { %v1421_v12 = vrot.slane %v1407_v46, %v2702_v13  ;;  %v1389_v17 = vrot.slane %v1375_v11, %v2702_v13  ;;  %v1238_v30 = vcombine.low %v3280_v52, %v3277_v8  ;;  %v1023_v23 = vcombine.high %v3695_v19, %v2435_v0  ;;  %v3698_v0 = vld [vmem:[#allocation11_spill] sm:$0xff] }
 0x100   : > { %v1152_v55 = vcombine.low %v1101_v56, %v1133_v9  ;;  %v3700_v47 = vcombine.low %v3698_v0, %v3699_v44  ;;  %v459_v11 = vcombine.high %v3104_v7, %v3147_v59  ;;  %v809_v7 = vrot.slane %v795_v49, %v2702_v13  ;;  %v3705_v49 = vld [vmem:[#allocation18_spill] sm:$0xff] }
 0x101   : > { %1661 = vrot.lane.b32.xlu1 %v676_v6, %s2346_s6  ;;  %1863 = vrot.lane.b32.xlu0 %v1427_v22, %s2351_s11  ;;  %v634_v6 = vrot.slane %v626_v39, %v2702_v13  ;;  %v677_v22 = vcombine.high %v625_v27, %v657_v2  ;;  %v1428_v51 = vcombine.low %v1389_v17, %v1421_v12 }
 0x102   : > { %v1071_v27 = vcombine.high %v3023_v14, %v3058_v57  ;;  %v1055_v2 = vcombine.high %v3027_v60, %v3073_v16  ;;  %v1246_v38 = vrot.slane %v1238_v30, %v2702_v13  ;;  %v1278_v58 = vrot.slane %v3700_v47, %v2702_v13 }
 0x103   : > { %v3319_v37 = vrot.slane %v1023_v23, %v2504_v45  ;;  %v489_v60 = vrot.slane %v475_v4, %v2702_v13  ;;  %v411_v57 = vcombine.high %v2458_v20, %v2470_v26  ;;  %v427_v16 = vcombine.high %v2452_v15, %v2468_v25  ;;  %v3702_v4 = vld [vmem:[#allocation16_spill] sm:$0xff] }
 0x104   : > { %v3337_v40 = vrot.slane %v1055_v2, %v2504_v45  ;;  %v443_v39 = vcombine.high %v3112_v1, %v3159_v3  ;;  %v1153_v20 = vcombine.high %v1101_v56, %v1133_v9  ;;  %v521_v26 = vrot.slane %v507_v31, %v2702_v13 }
 0x105   : > { %1745 = vrot.lane.b32.xlu1 %v952_v21, %s2347_s7  ;;  %1639 = vrot.lane.b32.xlu0 %v539_v41, %s2348_s8  ;;  %v3692_v41 = vld [vmem:[#allocation13_spill] sm:$0xff]  ;;  %v3697_v21 = vld [vmem:[#allocation7_spill] sm:$0xff]  ;;  %v763_v15 = vcombine.high %v3143_v28, %v3140_v29  ;;  %v1429_v5 = vcombine.high %v1389_v17, %v1421_v12  ;;  %v3354_v1 = vrot.slane %v411_v57, %v2504_v45  ;;  %s2083_s8 = scalar_lea.sflag [#allocation3], %s175_s27 }
 0x106   : > { %v3694_v24 = vcombine.low %v3692_v41, %v3693_v42  ;;  %v1039_v46 = vcombine.high %v3697_v21, %v3696_v50  ;;  %v3357_v59 = vrot.slane %v427_v16, %v2504_v45  ;;  %v3362_v28 = vrot.slane %v459_v11, %v2504_v45 }
 0x107   : > { %v3365_v3 = vrot.slane %v443_v39, %v2504_v45  ;;  %v540_v56 = vcombine.low %v489_v60, %v521_v26  ;;  %v777_v9 = vrot.slane %v763_v15, %v2702_v13  ;;  %v1291_v50 = vcombine.high %v1246_v38, %v1278_v58 }
 0x108   : > { %v666_v33 = vrot.slane %v3694_v24, %v2702_v13  ;;  %v3322_v14 = vrot.slane %v1039_v46, %v2504_v45  ;;  %v3701_v46 = vld [vmem:[#allocation15_spill] sm:$0xff] }
 0x109   : > { %1821 = vrot.lane.b32.xlu1 %v1289_v43, %s2350_s10  ;;  %1723 = vrot.lane.b32.xlu0 %v815_v61, %s2351_s11  ;;  %v953_v43 = vcombine.high %v913_v54, %v945_v48  ;;  %v3334_v54 = vrot.slane %v1071_v27, %v2504_v45  ;;  %v1290_v48 = vcombine.low %v1246_v38, %v1278_v58 }
 0x10a   : > { %v678_v63 = vcombine.low %v634_v6, %v666_v33  ;;  %v1102_v53 = vcombine.low %v3319_v37, %v3322_v14  ;;  %v522_v17 = vcombine.low %v3365_v3, %v3362_v28  ;;  %v816_v45 = vcombine.low %v777_v9, %v809_v7 }
 0x10b   : > { %v1134_v29 = vcombine.low %v3337_v40, %v3334_v54  ;;  %v3703_v27 = vcombine.low %v3701_v46, %v3702_v4  ;;  %v817_v38 = vcombine.high %v777_v9, %v809_v7  ;;  %v3704_v58 = vcombine.high %v3698_v0, %v3699_v44 }
 0x10c   : > { %v530_v24 = vrot.slane %v522_v17, %v2702_v13  ;;  %v3708_v0 = vcombine.high %v3692_v41, %v3693_v42  ;;  %v491_v9 = vcombine.high %v3354_v1, %v3357_v59 }
 0x10d   : > { %1905 = vrot.lane.b32.xlu1 %v1565_v35, %s2352_s18  ;;  %1799 = vrot.lane.b32.xlu0 %v1152_v55, %s2346_s6  ;;  %v1110_v35 = vrot.slane %v1102_v53, %v2702_v13  ;;  %v490_v55 = vcombine.low %v3354_v1, %v3357_v59  ;;  %v1142_v12 = vrot.slane %v1134_v29, %v2702_v13 }
 0x10f   : > { %v1154_v21 = vcombine.low %v1110_v35, %v1142_v12  ;;  %v1155_v16 = vcombine.high %v1110_v35, %v1142_v12  ;;  %v1992_v35 = vld [vmem:[%s3607_s2] sm:$0xff] }
 0x111   : > { %1681 = vrot.lane.b32.xlu1 %v677_v22, %s2350_s10  ;;  %1883 = vrot.lane.b32.xlu0 %v1428_v51, %s2347_s7  ;;  %v3316_v61 = vpop.permute.xlu0 %1807  ;;  %v679_v22 = vcombine.high %v634_v6, %v666_v33  ;;  %v498_v51 = vrot.slane %v490_v55, %v2702_v13  ;;  %v1239_v6 = vcombine.high %v3280_v52, %v3277_v8 }
 0x112   : > { %v541_v33 = vcombine.high %v489_v60, %v521_v26  ;;  %v627_v8 = vcombine.high %v3267_v62, %v3264_v18  ;;  %v1135_v52 = vcombine.high %v3337_v40, %v3334_v54  ;;  %v673_v18 = vrot.slane %v3708_v0, %v2702_v13 }
 0x113   : > { %v542_v47 = vcombine.low %v498_v51, %v530_v24  ;;  %v1253_v57 = vrot.slane %v1239_v6, %v2702_v13  ;;  %v3713_v6 = vld [vmem:[#allocation28_spill] sm:$0xff] }
 0x114   : > { %v641_v44 = vrot.slane %v627_v8, %v2702_v13 }
 0x115   : > { %1765 = vrot.lane.b32.xlu1 %v953_v43, %s2352_s18  ;;  %1701 = vrot.lane.b32.xlu0 %v678_v63, %s2349_s9  ;;  %v3346_v25 = vpop.permute.xlu0 %1887  ;;  %v1285_v43 = vrot.slane %v3704_v58, %v2702_v13  ;;  %v1103_v63 = vcombine.high %v3319_v37, %v3322_v14  ;;  %v1149_v37 = vrot.slane %v1135_v52, %v2702_v13 }
 0x116   : > { %v680_v42 = vcombine.low %v641_v44, %v673_v18 }
 0x117   : > { %v1117_v62 = vrot.slane %v1103_v63, %v2702_v13  ;;  %v1292_v40 = vcombine.low %v1253_v57, %v1285_v43  ;;  %v1293_v29 = vcombine.high %v1253_v57, %v1285_v43  ;;  %v3715_v57 = vcombine.low %v2995_v36, %v2980_v34  ;;  %v3717_v34 = vld [vmem:[#allocation31_spill] sm:$0xff]  ;;  %v3718_v36 = vld [vmem:[#allocation30_spill] sm:$0xff] }
 0x119   : > { %1841 = vrot.lane.b32.xlu1 %v1290_v48, %s2349_s9  ;;  %1819 = vrot.lane.b32.xlu0 %v1153_v20, %s2350_s10  ;;  %v3376_v30 = vpop.permute.xlu0 %1787  ;;  %v3382_v19 = vpop.permute.xlu1 %1667  ;;  %v3706_v48 = vld [vmem:[#allocation19_spill] sm:$0xff]  ;;  %v543_v20 = vcombine.high %v498_v51, %v530_v24  ;;  %v1156_v15 = vcombine.low %v1117_v62, %v1149_v37  ;;  %v3710_v51 = vld [vmem:[#allocation21_spill] sm:$0xff] }
 0x11a   : > { %v3707_v11 = vcombine.low %v3705_v49, %v3706_v48 }
 0x11d   : > { %1659 = vrot.lane.b32.xlu1 %v540_v56, %s2346_s6  ;;  %1903 = vrot.lane.b32.xlu0 %v1429_v5, %s2352_s18  ;;  %v3392_v31 = vpop.permute.xlu1 %1847  ;;  %v523_v5 = vcombine.high %v3365_v3, %v3362_v28  ;;  %v1157_v56 = vcombine.high %v1117_v62, %v1149_v37  ;;  %v505_v28 = vrot.slane %v491_v9, %v2702_v13  ;;  %v2353_v3 = vmov 0  }
 0x11e   : > { %2254 = vset.pattern.permute.xlu0 %v2353_v3  ;;  %v3719_v62 = vcombine.low %v3717_v34, %v3718_v36 }
 0x11f   : > { %v537_v55 = vrot.slane %v523_v5, %v2702_v13 }
 0x121   : > { %1743 = vrot.lane.b32.xlu1 %v816_v45, %s2347_s7  ;;  %1721 = vrot.lane.b32.xlu0 %v679_v22, %s2351_s11  ;;  %v3420_v14 = vpop.permute.xlu1 %1707  ;;  %v681_v45 = vcombine.high %v641_v44, %v673_v18  ;;  %v3709_v22 = vld [vmem:[#allocation20_spill] sm:$0xff]  ;;  %v545_v46 = vcombine.high %v505_v28, %v537_v55 }
 0x122   : > { %v3711_v1 = vcombine.low %v3709_v22, %v3710_v51 }
 0x123   : > { %v1786_v23 = vpop.permute.xlu0 %1785 }
 0x124   : > { %v1959_v2 = vsel %vm1914_vm2, %v3703_v27, %v1786_v23  ;;  %v544_v23 = vcombine.low %v505_v28, %v537_v55 }
 0x125   : > { %1861 = vrot.lane.b32.xlu1 %v1291_v50, %s2351_s11  ;;  %1839 = vrot.lane.b32.xlu0 %v1154_v21, %s2349_s9  ;;  %v1648_v7 = vpop.permute.xlu1 %1647 }
 0x129   : > { %1679 = vrot.lane.b32.xlu1 %v541_v33, %s2350_s10  ;;  %1699 = vrot.lane.b32.xlu0 %v542_v47, %s2349_s9  ;;  %v1828_v12 = vpop.permute.xlu1 %1827  ;;  %s2263_s9 = scalar_lea.vmem %s2100_s4, 256  ;;  %s2354_s10 = smov [#allocation2]  }
 0x12a   : > { %p2264_p12 = scmp.ne.s32.totalorder %s2100_s4, %s2263_s9  ;;  %s2267_s15 = sshll.u32 %s2354_s10, 4  ;;  %s2268_s15 = int_to_ptr.vmem [resolvable:$false] %s2267_s15 }
 0x12b   : > { %v1646_v60 = vpop.permute.xlu0 %1645  ;;  %p2270_p1 = scmp.lt.s32.totalorder %s2100_s4, %s2268_s15 }
 0x12c   : > { %v1918_v39 = vsel %vm1914_vm2, %v3707_v11, %v1646_v60  ;;  %p2265_p13 = pnand %p2264_p12, %p2415_p4 }
 0x12d   : > { %1763 = vrot.lane.b32.xlu1 %v817_v38, %s2352_s18  ;;  %1859 = vrot.lane.b32.xlu0 %v1155_v16, %s2351_s11  ;;  %v1688_v50 = vpop.permute.xlu1 %1687  ;;  %v3716_v16 = vld [vmem:[#allocation14_spill] sm:$0xff] }
 0x12e   : > { %v1960_v49 = vsel %vm1914_vm2, %v3716_v16, %v3376_v30  ;;  %p2266_p0 = pneg %p2265_p13 }
 0x12f   : > { %v1806_v54 = vpop.permute.xlu0 %1805  ;;  %v1965_v11 = vsel %vm1920_vm3, %v1960_v49, %v3316_v61  ;;  %v3720_v61 = vld [vmem:[#allocation17_spill] sm:$0xff] }
 0x130   : > { %v3423_v26 = vsel %vm1920_vm3, %v1959_v2, %v1806_v54  ;;  %v3712_v2 = vld [vmem:[#allocation27_spill] sm:$0xff]  ;;  %v1970_v18 = vsel %vm1926_vm4, %v1965_v11, %v1828_v12 }
 0x131   : > { %1881 = vrot.lane.b32.xlu1 %v1292_v40, %s2347_s7  ;;  %1719 = vrot.lane.b32.xlu0 %v543_v20, %s2351_s11  ;;  %v1826_v13 = vpop.permute.xlu1 %1825  ;;  %v3714_v33 = vcombine.low %v3712_v2, %v3713_v6  ;;  %v1975_v30 = vsel %vm1932_vm5, %v1970_v18, %v3392_v31  ;;  %v1919_v20 = vsel %vm1914_vm2, %v3720_v61, %v1648_v7  ;;  %s2269_s11 = scalar_lea.vmem %s2268_s15, 512 }
 0x132   : > { %p2271_p2 = scmp.lt.s32.totalorder %s2269_s11, %s2263_s9 }
 0x133   : > { %v1666_v41 = vpop.permute.xlu0 %1665 }
 0x134   : > { %v3428_v53 = vsel %vm1920_vm3, %v1918_v39, %v1666_v41  ;;  %p2272_p3 = por %p2271_p2, %p2270_p1 }
 0x135   : > { %1741 = vrot.lane.b32.xlu1 %v680_v42, %s2347_s7  ;;  %1879 = vrot.lane.b32.xlu0 %v1156_v15, %s2347_s7 }
 0x136   : > { %p2273_p5 = pnand %p2272_p3, %p2266_p0 }
 0x139   : > { %1901 = vrot.lane.b32.xlu1 %v1293_v29, %s2352_s18  ;;  %1899 = vrot.lane.b32.xlu0 %v1157_v56, %s2352_s18  ;;  %v1925_v29 = vsel %vm1920_vm3, %v1919_v20, %v3382_v19 }
 0x13a   : > { %v1931_v56 = vsel %vm1926_vm4, %v1925_v29, %v1688_v50 }
 0x13b   : > { %v1784_v17 = vpop.permute.xlu0 %1783 }
 0x13c   : > { %v3447_v59 = vsel %vm1914_vm2, %v3711_v1, %v1784_v17 }
 0x13d   : > { %1761 = vrot.lane.b32.xlu1 %v681_v45, %s2352_s18  ;;  %1995 = vperm.xlu0 %2254, %v1992_v35   ;;  %v1937_v35 = vsel %vm1932_vm5, %v1931_v56, %v3420_v14  ;;  %v1969_v14 = vsel %vm1926_vm4, %v3423_v26, %v1826_v13 }
 0x13f   : > { %v1868_v24 = vpop.permute.xlu0 %1867 }
 0x140   : > { %v1980_v40 = vsel %vm1938_vm6, %v1975_v30, %v1868_v24 }
 0x141   : > { %1739 = vrot.lane.b32.xlu1 %v544_v23, %s2347_s7  ;;  %v1985_v15 = vsel %vm1944_vm7, %v1980_v40, %v3346_v25  ;;  %s2097_s7 = scalar_lea.hbm %s3608_s3, %s2184_s29 }
 0x143   : > { %v3451_v21 = vpop.permute.xlu0 %1685 }
 0x145   : > { %1759 = vrot.lane.b32.xlu1 %v545_v46, %s2352_s18 }
 0x147   : > { %v3454_v4 = vpop.permute.xlu0 %1803 }
 0x14b   : > { %v1644_v27 = vpop.permute.xlu1 %1643  ;;  %v1706_v38 = vpop.permute.xlu0 %1705 }
 0x14c   : > { %v1917_v47 = vsel %vm1914_vm2, %v3714_v33, %v1644_v27 }
 0x14f   : > { %v1728_v58 = vpop.permute.xlu1 %1727 }
 0x150   : > { %v1943_v55 = vsel %vm1938_vm6, %v1937_v35, %v1728_v58  ;;  %v3721_v35 = vld [vmem:[#allocation32_spill] sm:$0xff] }
 0x153   : > { %v1846_v43 = vpop.permute.xlu1 %1845  ;;  %v1782_v63 = vpop.permute.xlu0 %1781 }
 0x154   : > { %v1957_v8 = vsel %vm1914_vm2, %v3715_v57, %v1782_v63  ;;  %v1974_v50 = vsel %vm1932_vm5, %v1969_v14, %v1846_v43  ;;  %v1930_v63 = vsel %vm1926_vm4, %v3428_v53, %v3451_v21 }
 0x155   : > { %v1936_v57 = vsel %vm1932_vm5, %v1930_v63, %v1706_v38 }
 0x157   : > { %v1664_v52 = vpop.permute.xlu1 %1663  ;;  %v1866_v60 = vpop.permute.xlu0 %1865 }
 0x158   : > { %v3468_v48 = vsel %vm1920_vm3, %v1917_v47, %v1664_v52  ;;  %v1979_v46 = vsel %vm1938_vm6, %v1974_v50, %v1866_v60  ;;  %v1963_v60 = vsel %vm1920_vm3, %v3447_v59, %v3454_v4 }
 0x15b   : > { %v1748_v39 = vpop.permute.xlu1 %1747  ;;  %v1642_v0 = vpop.permute.xlu0 %1641 }
 0x15c   : > { %v3477_v44 = vsel %vm1914_vm2, %v3719_v62, %v1642_v0  ;;  %v1949_v25 = vsel %vm1944_vm7, %v1943_v55, %v1748_v39  ;;  %v3722_v55 = vld [vmem:[#allocation33_spill] sm:$0xff] }
 0x15f   : > { %v1824_v37 = vpop.permute.xlu1 %1823  ;;  %v1726_v54 = vpop.permute.xlu0 %1725 }
 0x160   : > { %v1942_v26 = vsel %vm1938_vm6, %v1936_v57, %v1726_v54  ;;  %v1968_v11 = vsel %vm1926_vm4, %v1963_v60, %v1824_v37 }
 0x163   : > { %v1908_v41 = vpop.permute.xlu1 %1907  ;;  %v1802_v42 = vpop.permute.xlu0 %1801 }
 0x164   : > { %v3487_v5 = vsel %vm1920_vm3, %v1957_v8, %v1802_v42  ;;  %v1990_v31 = vsel %vm1950_vm8, %v1985_v15, %v1908_v41 }
 0x165   : > { %2176 = vmatprep.subr.msk.mxu0 %vm2002_vm9, %v1990_v31 }
 0x167   : > { %v1684_v9 = vpop.permute.xlu1 %1683  ;;  %v1886_v7 = vpop.permute.xlu0 %1885 }
 0x168   : > { %v1984_v27 = vsel %vm1944_vm7, %v1979_v46, %v1886_v7  ;;  %v1929_v37 = vsel %vm1926_vm4, %v3468_v48, %v1684_v9 }
 0x16b   : > { %v1768_v12 = vpop.permute.xlu1 %1767  ;;  %v1704_v17 = vpop.permute.xlu0 %1703 }
 0x16c   : > { %v1955_v45 = vsel %vm1950_vm8, %v1949_v25, %v1768_v12  ;;  %v1935_v54 = vsel %vm1932_vm5, %v1929_v37, %v1704_v17  ;;  %v3723_v25 = vcombine.low %v3721_v35, %v3722_v55 }
 0x16d   : > { %2177 = vmatpush1.msk.msra.mxu0 %vm2002_vm9, %v1955_v45 }
 0x16f   : > { %v1844_v19 = vpop.permute.xlu1 %1843  ;;  %v1780_v28 = vpop.permute.xlu0 %1779 }
 0x170   : > { %v1973_v53 = vsel %vm1932_vm5, %v1968_v11, %v1844_v19  ;;  %v1956_v12 = vsel %vm1914_vm2, %v3723_v25, %v1780_v28 }
 0x173   : > { %v1662_v3 = vpop.permute.xlu1 %1661  ;;  %v1864_v22 = vpop.permute.xlu0 %1863 }
 0x174   : > { %v1978_v21 = vsel %vm1938_vm6, %v1973_v53, %v1864_v22  ;;  %v1922_v17 = vsel %vm1920_vm3, %v3477_v44, %v1662_v3 }
 0x177   : > { %v1746_v51 = vpop.permute.xlu1 %1745  ;;  %v3500_v1 = vpop.permute.xlu0 %1639 }
 0x178   : > { %v1948_v13 = vsel %vm1944_vm7, %v1942_v26, %v1746_v51 }
 0x17b   : > { %v1822_v24 = vpop.permute.xlu1 %1821  ;;  %v1724_v23 = vpop.permute.xlu0 %1723 }
 0x17c   : > { %v1941_v40 = vsel %vm1938_vm6, %v1935_v54, %v1724_v23  ;;  %v1967_v56 = vsel %vm1926_vm4, %v3487_v5, %v1822_v24 }
 0x17f   : > { %v1906_v2 = vpop.permute.xlu1 %1905  ;;  %v1800_v6 = vpop.permute.xlu0 %1799 }
 0x180   : > { %v1989_v33 = vsel %vm1950_vm8, %v1984_v27, %v1906_v2  ;;  %v1961_v22 = vsel %vm1920_vm3, %v1956_v12, %v1800_v6  ;;  %v3724_v27 = vcombine.low %v3211_v32, %v3214_v10 }
 0x181   : > { %2033 = vmatprep.subr.mxu0 %v1989_v33 }
 0x182   : > { %v1915_v2 = vsel %vm1914_vm2, %v3724_v27, %v3500_v1 }
 0x183   : > { %v1682_v47 = vpop.permute.xlu1 %1681  ;;  %v1884_v58 = vpop.permute.xlu0 %1883 }
 0x184   : > { %v1983_v38 = vsel %vm1944_vm7, %v1978_v21, %v1884_v58  ;;  %v1928_v5 = vsel %vm1926_vm4, %v1922_v17, %v1682_v47 }
 0x187   : > { %v1766_v43 = vpop.permute.xlu1 %1765  ;;  %v1702_v8 = vpop.permute.xlu0 %1701 }
 0x188   : > { %v1954_v52 = vsel %vm1950_vm8, %v1948_v13, %v1766_v43  ;;  %v1934_v24 = vsel %vm1932_vm5, %v1928_v5, %v1702_v8  ;;  %v1991_v13 = vld [vmem:[%s3606_s1] sm:$0xff] }
 0x189   : > { %2034 = vmatpush1.msra.mxu0 %v1954_v52 }
 0x18b   : > { %v1842_v16 = vpop.permute.xlu1 %1841  ;;  %v1820_v49 = vpop.permute.xlu0 %1819 }
 0x18c   : > { %v1972_v48 = vsel %vm1932_vm5, %v1967_v56, %v1842_v16  ;;  %v1966_v23 = vsel %vm1926_vm4, %v1961_v22, %v1820_v49 }
 0x18f   : > { %v1660_v39 = vpop.permute.xlu1 %1659  ;;  %v1904_v0 = vpop.permute.xlu0 %1903 }
 0x190   : > { %v1988_v18 = vsel %vm1950_vm8, %v1983_v38, %v1904_v0  ;;  %v1921_v47 = vsel %vm1920_vm3, %v1915_v2, %v1660_v39 }
 0x191   : > { %2035 = vmatprep.subr.mxu0 %v1988_v18 }
 0x193   : > { %v1744_v34 = vpop.permute.xlu1 %1743  ;;  %v1722_v36 = vpop.permute.xlu0 %1721 }
 0x194   : > { %v1947_v61 = vsel %vm1944_vm7, %v1941_v40, %v1744_v34  ;;  %v1940_v14 = vsel %vm1938_vm6, %v1934_v24, %v1722_v36 }
 0x197   : > { %v1862_v62 = vpop.permute.xlu1 %1861  ;;  %v1840_v30 = vpop.permute.xlu0 %1839 }
 0x198   : > { %v1977_v9 = vsel %vm1938_vm6, %v1972_v48, %v1862_v62  ;;  %v1971_v28 = vsel %vm1932_vm5, %v1966_v23, %v1840_v30 }
 0x19b   : > { %v1680_v59 = vpop.permute.xlu1 %1679  ;;  %v1700_v4 = vpop.permute.xlu0 %1699 }
 0x19c   : > { %v1927_v63 = vsel %vm1926_vm4, %v1921_v47, %v1680_v59 }
 0x19d   : > { %v1933_v26 = vsel %vm1932_vm5, %v1927_v63, %v1700_v4 }
 0x19f   : > { %v1764_v20 = vpop.permute.xlu1 %1763  ;;  %v1860_v41 = vpop.permute.xlu0 %1859 }
 0x1a0   : > { %v1953_v42 = vsel %vm1950_vm8, %v1947_v61, %v1764_v20  ;;  %v1976_v44 = vsel %vm1938_vm6, %v1971_v28, %v1860_v41 }
 0x1a1   : > { %2036 = vmatpush1.msra.mxu0 %v1953_v42 }
 0x1a3   : > { %v1882_v15 = vpop.permute.xlu1 %1881  ;;  %v1720_v31 = vpop.permute.xlu0 %1719 }
 0x1a4   : > { %v1982_v45 = vsel %vm1944_vm7, %v1977_v9, %v1882_v15  ;;  %v1939_v10 = vsel %vm1938_vm6, %v1933_v26, %v1720_v31 }
 0x1a7   : > { %v1742_v29 = vpop.permute.xlu1 %1741  ;;  %v1880_v7 = vpop.permute.xlu0 %1879 }
 0x1a8   : > { %v1946_v3 = vsel %vm1944_vm7, %v1940_v14, %v1742_v29  ;;  %v1981_v6 = vsel %vm1944_vm7, %v1976_v44, %v1880_v7 }
 0x1ab   : > { %v1902_v19 = vpop.permute.xlu1 %1901  ;;  %v1900_v50 = vpop.permute.xlu0 %1899 }
 0x1ac   : > { %v1987_v51 = vsel %vm1950_vm8, %v1982_v45, %v1902_v19  ;;  %v1986_v58 = vsel %vm1950_vm8, %v1981_v6, %v1900_v50 }
 0x1ad   : > { %2037 = vmatprep.subr.mxu0 %v1987_v51 }
 0x1af   : > { %v1762_v46 = vpop.permute.xlu1 %1761 }
 0x1b0   : > { %v1952_v33 = vsel %vm1950_vm8, %v1946_v3, %v1762_v46 }
 0x1b1   : > { %2038 = vmatpush1.msra.mxu0 %v1952_v33 }
 0x1b2   : > { %2039 = vmatprep.subr.mxu0 %v1986_v58 }
 0x1b3   : > { %v1740_v57 = vpop.permute.xlu1 %1739 }
 0x1b4   : > { %v1945_v32 = vsel %vm1944_vm7, %v1939_v10, %v1740_v57 }
 0x1b7   : > { %v1760_v1 = vpop.permute.xlu1 %1759 }
 0x1b8   : > { %v1951_v43 = vsel %vm1950_vm8, %v1945_v32, %v1760_v1  ;;  %v1996_v8 = vpop.permute.xlu0 %1995 }
 0x1b9   : > { %2040 = vmatpush1.msra.mxu0 %v1951_v43 }
 0x1ba   : > { %2178 = vmatmul.mubr.msk.f32.vlgmr.msra.gmra.mxu0 %vm1998_vm10, %v1991_v13 }
 0x27a   : > { %v2075_v52 = vpop.f32.mrf.mxu0 }
 0x27b   : > { %v2076_v60 = vadd.f32 %v2075_v52, %v1996_v8 }
 0x27c   : > { %v2077_v16 = vpop.f32.mrf.mxu0 }
 0x27d   : > { %2080 = vst [vmem:[%s177_s30] sm:$0xff] %v2076_v60  ;;  %v2078_v49 = vadd.f32 %v2077_v16, %v1996_v8 }
 0x27f   : > { %2081 = vst [vmem:[%s177_s30 + $0x8] sm:$0xff] %v2078_v49 }
 0x280   : > { %2276 = shalt.err (!%p2273_p5)
}
 0x281   : > { %s2277_s18 = scalar_lea.hbm %s2097_s7, 256  ;;  %s2281_s23 = scalar_lea.hbm %s3608_s3, 512 }
 0x282   : > { %p2278_p6 = scmp.ne.s32.totalorder %s2097_s7, %s2277_s18  ;;  %p2282_p10 = scmp.lt.s32.totalorder %s2097_s7, %s3608_s3 }
 0x283   : > { %p2283_p11 = scmp.lt.s32.totalorder %s2281_s23, %s2277_s18 }
 0x284   : > { %p2279_p7 = pnand %p2278_p6, %p2415_p4 }
 0x285   : > { %p2284_p12 = por %p2283_p11, %p2282_p10 }
 0x286   : > { %p2280_p9 = pneg %p2279_p7 }
 0x288   : > { %p2285_p13 = pnand %p2284_p12, %p2280_p9 }
 0x28a   : > { %2288 = shalt.err (!%p2285_p13)
}
 0x28b   : > { %2186 = dma.vmem_to_hbm [thread:$0]  (%p2415_p4), %s2100_s4, 256, %s2097_s7, %s2083_s8  }
 0x28c PF: > { %p2192_p0 = scmp.ge.s32.totalorder %s2339_s17, 2  ;;  %s2111_s28 = sand.u32 1, %s2319_s12  }
 0x28d   : > { %s2112_s29 = scalar_lea.sflag [#allocation3], %s2111_s28 }
 0x28e   : > { %p2189_p1 = pnand %p2192_p0, %p2422_p8 }
 0x290   : > { %p2190_p2 = pneg %p2189_p1 }
 0x292   : > { %2314 = dma.done.wait (%p2190_p2), %s2112_s29, 256  }
 0x293   : > { %2316 = vsyncadd (%p2190_p2), %s2112_s29, 4294967040  ;;  %s16_s17 = sadd.s32 1, %s2339_s17   ;;  %s3725_s12 = smov %s2323_s13 }
 0x294   : > { %p13_p3 = scmp.ge.s32.totalorder %s16_s17, 4   ;;  %s3726_s13 = smov %s2327_s14 }
 0x295   : > { %s3727_s14 = smov %s2428_s25  ;;  %s3728_s15 = smov %s2335_s16 }
 0x296   : > { %s3729_s16 = smov %s3731_s20  ;;  %15 = sbr.rel (!%p13_p3) target bundleno = 4 (0x4), region = 67 }
 0x29b   :  { %2117 = vsyncpa [#allocation3], 1 }
 0x29c   :  { %2119 = vsyncpa [#allocation3 + $0x1], 1 }

</bundles_post_ra>
